<compile_context>
chip_gen: v7x
topology: tpu7x:2x2x1
jax: 0.10.0
libtpu: 0.0.40
codegen_flags: <defaults>
</compile_context>

<pallas_src>
import jax
import jax.numpy as jnp
from jax.experimental import pallas as pl
from jax.experimental.pallas import tpu as pltpu

IN_DIM = 10
HID_DIM = 20
OUT_DIM = 5

_LANE_MULT = 256  # multiple of 256 feeds the v6e/v7x 256-wide MXU; also 128-aligned for v5e


def _round_up(x, m):
    return ((x + m - 1) // m) * m


def net_kernel(x_ref, w1_ref, b1_ref, w2_ref, b2_ref, o_ref):
    # x_ref : (IN_DIM, TB)   feature-major batch tile (f32 or bf16)
    # w1_ref: (HID_DIM, IN_DIM)   (PyTorch (out, in) layout), b1_ref: (HID_DIM, 1)
    # w2_ref: (OUT_DIM, HID_DIM),                             b2_ref: (OUT_DIM, 1)
    # o_ref : (OUT_DIM, TB)
    xT = x_ref[...].astype(jnp.float32)  # cheap VALU upcast; lets bf16 x halve HBM traffic

    # fc1 + ReLU (MXU matmul, f32 accumulation, batch on the lane/N axis)
    h = jnp.dot(w1_ref[...], xT, preferred_element_type=jnp.float32) + b1_ref[...]
    h = jnp.maximum(h, 0.0)

    # fc2
    logits = jnp.dot(w2_ref[...], h, preferred_element_type=jnp.float32) + b2_ref[...]

    # Numerically stable softmax over the feature axis (axis 0 here == dim=1 of
    # the row-major view).  Approx reciprocal goes to the EUP slot; one Newton
    # step restores ~exact f32 normalization at negligible VPU cost.
    m = jnp.max(logits, axis=0, keepdims=True)
    e = jnp.exp(logits - m)
    denom = jnp.sum(e, axis=0, keepdims=True)
    r = pl.reciprocal(denom, approx=True)
    r = r * (2.0 - denom * r)              # Newton-Raphson refinement
    o_ref[...] = (e * r).astype(o_ref.dtype)


def net_forward_t(xT, w1, b1, w2, b2, *, tb=65536, out_dtype=None):
    """Feature-major forward pass.

    xT: (IN_DIM, B) f32 or bf16; weights in PyTorch (out, in) layout.
    Returns softmax(fc2(relu(fc1(x))), feature axis) of shape (OUT_DIM, B).
    """
    in_dim, B = xT.shape
    assert in_dim == IN_DIM
    out_dtype = xT.dtype if out_dtype is None else out_dtype

    # Pad the batch (lane) axis only up to a 256 multiple, never to a full tile.
    # (Producers emitting 256-aligned batches make this copy disappear entirely.)
    Bp = _round_up(max(B, 1), _LANE_MULT)
    if Bp != B:
        xT = jnp.pad(xT, ((0, 0), (0, Bp - B)))

    # Lane tile: as large as allowed (amortizes ~0.35us/step pipeline overhead),
    # a multiple of 256, and split into >=2 grid steps when possible so v7x's
    # second TensorCore gets work via the "parallel" dimension semantics.
    tile = min(_round_up(tb, _LANE_MULT), Bp)
    if pl.cdiv(Bp, tile) < 2 and Bp >= 2 * _LANE_MULT:
        tile = _round_up(pl.cdiv(Bp, 2), _LANE_MULT)
    grid = (pl.cdiv(Bp, tile),)  # last block may be ragged; Pallas masks OOB lanes

    w1c = w1.astype(jnp.float32)
    w2c = w2.astype(jnp.float32)
    b1c = b1.reshape(HID_DIM, 1).astype(jnp.float32)
    b2c = b2.reshape(OUT_DIM, 1).astype(jnp.float32)

    # VMEM budget: double-buffered x/out tiles + intermediate (HID/OUT, tile)
    # scratch, with 2x headroom.  Floor at 32 MiB, cap at 48 MiB (safe on
    # v5e/v6e 128 MiB and v7x 64 MiB physical VMEM).
    x_blk = 2 * _round_up(IN_DIM, 8) * tile * xT.dtype.itemsize
    o_blk = 2 * _round_up(OUT_DIM, 8) * tile * jnp.dtype(out_dtype).itemsize
    scratch = (_round_up(HID_DIM, 8) + 2 * _round_up(OUT_DIM, 8)) * tile * 4
    vmem_limit = int(min(48 << 20, max(32 << 20, 2 * (x_blk + o_blk + scratch))))

    flops = 2 * Bp * (IN_DIM * HID_DIM + HID_DIM * OUT_DIM)
    bytes_accessed = (xT.dtype.itemsize * IN_DIM * Bp
                      + jnp.dtype(out_dtype).itemsize * OUT_DIM * Bp
                      + 4 * (HID_DIM * IN_DIM + HID_DIM + OUT_DIM * HID_DIM + OUT_DIM))

    outT = pl.pallas_call(
        net_kernel,
        out_shape=jax.ShapeDtypeStruct((OUT_DIM, Bp), out_dtype),
        grid=grid,
        in_specs=[
            # Batch tile of the input: the only operand that changes per grid step.
            pl.BlockSpec((IN_DIM, tile), lambda i: (0, i)),
            # Weights / biases: constant index_maps -> fetched once, VMEM-resident.
            pl.BlockSpec((HID_DIM, IN_DIM), lambda i: (0, 0)),
            pl.BlockSpec((HID_DIM, 1), lambda i: (0, 0)),
            pl.BlockSpec((OUT_DIM, HID_DIM), lambda i: (0, 0)),
            pl.BlockSpec((OUT_DIM, 1), lambda i: (0, 0)),
        ],
        out_specs=pl.BlockSpec((OUT_DIM, tile), lambda i: (0, i)),
        compiler_params=pltpu.CompilerParams(
            dimension_semantics=("parallel",),   # lets v7x shard batch tiles over 2 TCs
            vmem_limit_bytes=vmem_limit,
        ),
        cost_estimate=pl.CostEstimate(
            flops=flops,
            transcendentals=Bp * OUT_DIM,
            bytes_accessed=bytes_accessed,
        ),
    )(xT, w1c, b1c, w2c, b2c)

    return outT if Bp == B else outT[:, :B]


def net_forward(x, w1, b1, w2, b2, **kwargs):
    """Row-major compatibility wrapper matching the PyTorch module: (B,10)->(B,5).

    NOTE: this materializes x.T and out.T in HBM (~2-3x extra memory traffic for
    a bandwidth-bound op).  Prefer net_forward_t() and fuse the layout change
    into the producer/consumer ops of the surrounding graph.
    """
    return net_forward_t(x.T, w1, b1, w2, b2, **kwargs).T


def init_params(key):
    """PyTorch nn.Linear-style init U(-1/sqrt(fan_in), 1/sqrt(fan_in)), (out,in) layout."""
    k1, k2, k3, k4 = jax.random.split(key, 4)
    bound1 = 1.0 / (IN_DIM ** 0.5)
    bound2 = 1.0 / (HID_DIM ** 0.5)
    w1 = jax.random.uniform(k1, (HID_DIM, IN_DIM), jnp.float32, -bound1, bound1)
    b1 = jax.random.uniform(k2, (HID_DIM,), jnp.float32, -bound1, bound1)
    w2 = jax.random.uniform(k3, (OUT_DIM, HID_DIM), jnp.float32, -bound2, bound2)
    b2 = jax.random.uniform(k4, (OUT_DIM,), jnp.float32, -bound2, bound2)
    return w1, b1, w2, b2


def reference_forward(x, w1, b1, w2, b2):
    # precision=HIGHEST so the reference itself does not lose accuracy to
    # XLA's default TPU matmul precision.
    hi = jax.lax.Precision.HIGHEST
    h = jnp.maximum(jnp.dot(x, w1.T, precision=hi) + b1, 0.0)
    logits = jnp.dot(h, w2.T, precision=hi) + b2
    return jax.nn.softmax(logits, axis=1)


if __name__ == "__main__":
    key = jax.random.PRNGKey(0)
    kx, kx2, kp = jax.random.split(key, 3)
    w1, b1, w2, b2 = init_params(kp)

    # ---- Primary feature-major path -------------------------------------
    # B=600 exercises 256-padding, a >=2-step grid and a ragged last block.
    B = 600
    xT = jax.random.normal(kx, (IN_DIM, B), dtype=jnp.float32)
    out_t = jax.block_until_ready(net_forward_t(xT, w1, b1, w2, b2))
    ref = reference_forward(xT.T, w1, b1, w2, b2)
    assert out_t.shape == (OUT_DIM, B)
    # Tolerance covers MXU f32 pass-splitting differences vs. the XLA reference.
    assert jnp.allclose(out_t.T, ref, atol=1e-3, rtol=1e-3)
    # Newton-refined reciprocal -> rows normalize to 1 within f32 rounding.
    assert jnp.allclose(jnp.sum(out_t, axis=0), jnp.ones((B,), jnp.float32), atol=1e-5)

    # ---- bf16 input/output path (halves x and out HBM traffic) ----------
    out_bf = jax.block_until_ready(net_forward_t(xT.astype(jnp.bfloat16), w1, b1, w2, b2))
    assert out_bf.dtype == jnp.bfloat16
    assert jnp.allclose(out_bf.T.astype(jnp.float32), ref, atol=1e-2, rtol=1e-2)

    # ---- Row-major compatibility wrapper (PyTorch module contract) ------
    x_row = jax.random.normal(kx2, (8, IN_DIM), dtype=jnp.float32)
    out_row = jax.block_until_ready(net_forward(x_row, w1, b1, w2, b2))
    ref_row = reference_forward(x_row, w1, b1, w2, b2)
    assert out_row.shape == (8, OUT_DIM)
    assert jnp.allclose(out_row, ref_row, atol=1e-3, rtol=1e-3)

    print("KERNEL_OK")
</pallas_src>

<mosaic_0001>
module attributes {stable_mosaic.version = 11 : i64} {
  func.func @net_kernel(%arg0: i32, %arg1: memref<10x512xf32, #tpu.memory_space<vmem>>, %arg2: memref<20x10xf32, #tpu.memory_space<vmem>>, %arg3: memref<20x1xf32, #tpu.memory_space<vmem>>, %arg4: memref<5x20xf32, #tpu.memory_space<vmem>>, %arg5: memref<5x1xf32, #tpu.memory_space<vmem>>, %arg6: memref<5x512xf32, #tpu.memory_space<vmem>>) attributes {dimension_semantics = [#tpu.dimension_semantics<parallel>], iteration_bounds = array<i64: 2>, scalar_prefetch = 0 : i64, scratch_operands = 0 : i64, tpu.core_type = #tpu.core_type<tc>, window_params = [{transform_indices = @transform_0, window_bounds = array<i64: 10, 512>}, {pipeline_mode = #tpu.pipeline_mode<synchronous>, transform_indices = @transform_1, window_bounds = array<i64: 20, 10>}, {pipeline_mode = #tpu.pipeline_mode<synchronous>, transform_indices = @transform_2, window_bounds = array<i64: 20, 1>}, {pipeline_mode = #tpu.pipeline_mode<synchronous>, transform_indices = @transform_3, window_bounds = array<i64: 5, 20>}, {pipeline_mode = #tpu.pipeline_mode<synchronous>, transform_indices = @transform_4, window_bounds = array<i64: 5, 1>}, {transform_indices = @transform_5, window_bounds = array<i64: 5, 512>}]} {
    %c0 = arith.constant 0 : index
    %c0_0 = arith.constant 0 : index
    %0 = vector.load %arg1[%c0, %c0_0] : memref<10x512xf32, #tpu.memory_space<vmem>>, vector<10x512xf32>
    %c0_1 = arith.constant 0 : index
    %c0_2 = arith.constant 0 : index
    %1 = vector.load %arg2[%c0_1, %c0_2] : memref<20x10xf32, #tpu.memory_space<vmem>>, vector<20x10xf32>
    %cst = arith.constant dense<0.000000e+00> : vector<20x512xf32>
    %2 = tpu.matmul %1, %0, %cst {dimension_numbers = #tpu.dot_dimension_numbers<[1], [0], [0], [1], [0, 0, 1, 1], [], []>} : vector<20x10xf32>, vector<10x512xf32>, vector<20x512xf32> -> vector<20x512xf32>
    %c0_3 = arith.constant 0 : index
    %c0_4 = arith.constant 0 : index
    %3 = vector.load %arg3[%c0_3, %c0_4] : memref<20x1xf32, #tpu.memory_space<vmem>>, vector<20x1xf32>
    %4 = vector.broadcast %3 : vector<20x1xf32> to vector<20x512xf32>
    %5 = arith.addf %2, %4 : vector<20x512xf32>
    %cst_5 = arith.constant 0.000000e+00 : f32
    %6 = vector.broadcast %cst_5 : f32 to vector<20x512xf32>
    %7 = arith.maximumf %5, %6 : vector<20x512xf32>
    %c0_6 = arith.constant 0 : index
    %c0_7 = arith.constant 0 : index
    %8 = vector.load %arg4[%c0_6, %c0_7] : memref<5x20xf32, #tpu.memory_space<vmem>>, vector<5x20xf32>
    %cst_8 = arith.constant dense<0.000000e+00> : vector<5x512xf32>
    %9 = tpu.matmul %8, %7, %cst_8 {dimension_numbers = #tpu.dot_dimension_numbers<[1], [0], [0], [1], [0, 0, 1, 1], [], []>} : vector<5x20xf32>, vector<20x512xf32>, vector<5x512xf32> -> vector<5x512xf32>
    %c0_9 = arith.constant 0 : index
    %c0_10 = arith.constant 0 : index
    %10 = vector.load %arg5[%c0_9, %c0_10] : memref<5x1xf32, #tpu.memory_space<vmem>>, vector<5x1xf32>
    %11 = vector.broadcast %10 : vector<5x1xf32> to vector<5x512xf32>
    %12 = arith.addf %9, %11 : vector<5x512xf32>
    %cst_11 = arith.constant dense<0xFF800000> : vector<512xf32>
    %13 = vector.multi_reduction <maximumf>, %12, %cst_11 [0] : vector<5x512xf32> to vector<512xf32>
    %14 = vector.shape_cast %13 : vector<512xf32> to vector<1x512xf32>
    %15 = vector.broadcast %14 : vector<1x512xf32> to vector<5x512xf32>
    %16 = arith.subf %12, %15 : vector<5x512xf32>
    %17 = math.exp %16 : vector<5x512xf32>
    %cst_12 = arith.constant dense<0.000000e+00> : vector<512xf32>
    %18 = vector.multi_reduction <add>, %17, %cst_12 [0] : vector<5x512xf32> to vector<512xf32>
    %19 = vector.shape_cast %18 : vector<512xf32> to vector<1x512xf32>
    %20 = tpu.reciprocal %19 {approx = true} : vector<1x512xf32> -> vector<1x512xf32>
    %21 = arith.mulf %19, %20 : vector<1x512xf32>
    %cst_13 = arith.constant 2.000000e+00 : f32
    %22 = vector.broadcast %cst_13 : f32 to vector<1x512xf32>
    %23 = arith.subf %22, %21 : vector<1x512xf32>
    %24 = arith.mulf %20, %23 : vector<1x512xf32>
    %25 = vector.broadcast %24 : vector<1x512xf32> to vector<5x512xf32>
    %26 = arith.mulf %17, %25 : vector<5x512xf32>
    %c0_14 = arith.constant 0 : index
    %c0_15 = arith.constant 0 : index
    %27 = vector.load %arg6[%c0_14, %c0_15] : memref<5x512xf32, #tpu.memory_space<vmem>>, vector<5x512xf32>
    tpu.vector_store %arg6[%c0_14, %c0_15], %26 {strides = array<i32>} : memref<5x512xf32, #tpu.memory_space<vmem>>, vector<5x512xf32>,
    return
  }
  func.func @transform_0(%arg0: i32) -> (i32, i32) {
    %c0_i32 = arith.constant 0 : i32
    %c0_i32_0 = arith.constant 0 : i32
    return %c0_i32, %arg0 : i32, i32
  }
  func.func @transform_1(%arg0: i32) -> (i32, i32) {
    %c0_i32 = arith.constant 0 : i32
    %c0_i32_0 = arith.constant 0 : i32
    %c0_i32_1 = arith.constant 0 : i32
    return %c0_i32, %c0_i32_0 : i32, i32
  }
  func.func @transform_2(%arg0: i32) -> (i32, i32) {
    %c0_i32 = arith.constant 0 : i32
    %c0_i32_0 = arith.constant 0 : i32
    %c0_i32_1 = arith.constant 0 : i32
    return %c0_i32, %c0_i32_0 : i32, i32
  }
  func.func @transform_3(%arg0: i32) -> (i32, i32) {
    %c0_i32 = arith.constant 0 : i32
    %c0_i32_0 = arith.constant 0 : i32
    %c0_i32_1 = arith.constant 0 : i32
    return %c0_i32, %c0_i32_0 : i32, i32
  }
  func.func @transform_4(%arg0: i32) -> (i32, i32) {
    %c0_i32 = arith.constant 0 : i32
    %c0_i32_0 = arith.constant 0 : i32
    %c0_i32_1 = arith.constant 0 : i32
    return %c0_i32, %c0_i32_0 : i32, i32
  }
  func.func @transform_5(%arg0: i32) -> (i32, i32) {
    %c0_i32 = arith.constant 0 : i32
    %c0_i32_0 = arith.constant 0 : i32
    return %c0_i32, %arg0 : i32, i32
  }
}

</mosaic_0001>

<bundles_post_ra>
// kernel: tpu_custom_call.1
= control target key start
LH: loop header
LB: loop body
LE: loop exit
PB: predicated region body
PF: predicated region fallthrough
CT: control target
= control target key end

     0   :  { %10 = vsyncpa [#allocation3], 0  ;;  %s1319_s0 = inlined_call_operand.hbm [shape: f32[10,768], index: 0, kind: input, shape index: {}]   ;;  %s1320_s1 = inlined_call_operand.vmem [shape: f32[20,10], index: 1, kind: input, shape index: {}]   ;;  %s1321_s2 = inlined_call_operand.vmem [shape: f32[20,1], index: 2, kind: input, shape index: {}]   ;;  %s1322_s3 = inlined_call_operand.vmem [shape: f32[5,20], index: 3, kind: input, shape index: {}]   ;;  %s1323_s4 = inlined_call_operand.vmem [shape: f32[5,1], index: 4, kind: input, shape index: {}]   ;;  %s1324_s5 = inlined_call_operand.hbm [shape: f32[5,768], index: 5, kind: output, shape index: {}]  }
   0x1   :  { %12 = vsyncpa [#allocation3 + $0x1], 0 }
   0x2   :  { %13 = vsyncpa [#allocation4], 0 }
   0x3   :  { %15 = vsyncpa [#allocation4 + $0x1], 0  ;;  %s1098_s18 = smov 0   ;;  %s1100_s19 = smov 0  }
   0x4   :  { %s1102_s20 = smov 0   ;;  %s1104_s21 = smov 0  }
   0x5 LB: > { %s1119_s22 = sadd.s32 4294967295, %s1059_s21   ;;  %s840_s23 = sadd.s32 4294967294, %s1059_s21   ;;  %s1059_s21 = sphi %s1104_s21, %s1336_s21   ;;  %s1055_s20 = sphi %s1102_s20, %s1335_s20   ;;  %s1051_s19 = sphi %s1100_s19, %s1334_s19   ;;  %s1047_s18 = sphi %s1098_s18, %s1333_s18  }
   0x6   : > { %s1123_s24 = sadd.s32 1, %s1059_s21   ;;  %s28_s25 = sadd.s32 1, %s1055_s20 }
   0x7   : > { %s25_s26 = ssub.s32 %s1059_s21, %s1123_s24  ;;  %p35_p0 = scmp.ne.s32.totalorder %s1055_s20, %s1051_s19 }
   0x8   : > { %p26_p1 = scmp.eq.s32.totalorder %s25_s26, 0  ;;  %p36_p2 = scmp.eq.s32.totalorder %s1059_s21, 0 }
   0x9   : > { %p41_p3 = scmp.ne.s32.totalorder %s1051_s19, %s1047_s18  ;;  %p42_p4 = scmp.eq.s32.totalorder %s1119_s22, 0 }
   0xa   : > { %s1135_s27 = scalar_select %p26_p1, %s1055_s20, %s28_s25  }
   0xb   : > { %p37_p5 = por %p36_p2, %p35_p0  ;;  %p1137_p6 = por %p42_p4, %p41_p3 }
   0xc   : > { %p149_p7 = scmp.eq.s32.totalorder %s1119_s22, 1  ;;  %p155_p8 = scmp.eq.s32.totalorder %s840_s23, 1 }
   0xd   : > { %p1325_p11 = scmp.ge.s32.totalorder %s1059_s21, 2 }
   0xe   : > { %p1142_p9 = por %p149_p7, %p35_p0  ;;  %p1146_p10 = por %p155_p8, %p41_p3 }
   0xf   : > { %183 = sbr.rel (%p1325_p11) target bundleno = 57 (0x39), region = 32 }
  0x10   : > { %s1328_s30 = scalar_select %p1146_p10, 1, 0 }
  0x16   : > { %186 = sbr.rel (!%p37_p5) target bundleno = 57 (0x39), region = 36  ;;  %s187_s6 = sand.u32 (%p37_p5), 1, %s1055_s20  }
  0x17   : > { %s844_s7 = sshll.u32 (%p37_p5), %s1059_s21, 2  ;;  %s843_s8 = sshll.u32 (%p37_p5), %s187_s6, 6 }
  0x18   : > { %s193_s9 = ssub.s32 (%p37_p5), 6, %s844_s7  ;;  %s1161_s12 = scalar_lea.sflag (%p37_p5), [#allocation3], %s187_s6 }
  0x19   : > { %p194_p12 = scmp.lt.s32.totalorder (%p37_p5), %s193_s9, 4  ;;  %s191_s13 = scalar_lea.vmem (%p37_p5), [#allocation2], %s843_s8 }
  0x1d   : > { %s1338_s9 = smov (!%p194_p12, %s193_s9), 4 }
  0x1e   : > { %s1158_s10 = sshll.u32 %s1338_s9, 8 }
  0x1f   : > { %s198_s11 = ssub.s32 1024, %s1158_s10 }
  0x20   : > { %199 = vsyncadd %s1161_s12, %s198_s11  ;;  %p846_p13 = scmp.ne.s32.totalorder %s1158_s10, 0  ;;  %s879_s14 = sshll.u32 %s1059_s21, 9 }
  0x21   : > { %s1169_s17 = scalar_lea.hbm %s1319_s0, %s879_s14  ;;  %s848_s23 = sshll.u32 %s1338_s9, 3 }
  0x22   : > { %s205_s25 = sshll.u32 %s191_s13, 4  ;;  %s965_s26 = scalar_lea.hbm %s1169_s17, %s1158_s10  ;;  %s1172_s25 = int_to_ptr.vmem [resolvable:$true] %s205_s25 }
  0x23   : > { %p966_p0 = scmp.ne.s32.totalorder %s1169_s17, %s965_s26  ;;  %s969_s8 = scalar_lea.hbm %s1319_s0, 1536 }
  0x24   : > { %p970_p3 = scmp.lt.u32.totalorder %s1169_s17, %s1319_s0  ;;  %p971_p4 = scmp.lt.u32.totalorder %s969_s8, %s965_s26 }
  0x25   : > { %p967_p1 = pnand %p966_p0, %p846_p13  ;;  %p973_p7 = scmp.lt.u32.totalorder %s965_s26, %s1169_s17 }
  0x26   : > { %p972_p5 = por %p971_p4, %p970_p3 }
  0x27   : > { %p968_p2 = pneg %p967_p1 }
  0x28   : > { %p974_p8 = por %p973_p7, %p972_p5 }
  0x2a   : > { %p975_p12 = pnand %p974_p8, %p968_p2 }
  0x2c   : > { %978 = shalt.err (!%p975_p12)
}
  0x2d   : > { %s979_s13 = scalar_lea.vmem %s1172_s25, %s1158_s10  ;;  %s1061_s15 = smov [#allocation2]  }
  0x2e   : > { %p980_p0 = scmp.ne.s32.totalorder %s1172_s25, %s979_s13  ;;  %s983_s16 = sshll.u32 %s1061_s15, 4  ;;  %s984_s16 = int_to_ptr.vmem [resolvable:$false] %s983_s16 }
  0x2f   : > { %s985_s6 = scalar_lea.vmem %s984_s16, 2048  ;;  %p986_p10 = scmp.lt.s32.totalorder %s1172_s25, %s984_s16 }
  0x30   : > { %p981_p1 = pnand %p980_p0, %p846_p13  ;;  %p987_p3 = scmp.lt.s32.totalorder %s985_s6, %s979_s13 }
  0x32   : > { %p982_p11 = pneg %p981_p1  ;;  %p988_p4 = por %p987_p3, %p986_p10 }
  0x34   : > { %p989_p5 = pnand %p988_p4, %p982_p11 }
  0x36   : > { %992 = shalt.err (!%p989_p5)
}
  0x37   : > { %s1062_s26 = smov 768   ;;  %s1063_s7 = smov 512  }
  0x38   : > { %211 = dma.hbm_to_vmem [thread:$0]  (%p846_p13), %s1169_s17, %s1158_s10, %s1172_s25, %s1161_s12, %s1062_s26, %s1063_s7, %s848_s23  }
  0x39 PF: > { %p851_p2 = scmp.ge.s32.totalorder %s1059_s21, 1  ;;  %p213_p7 = scmp.lt.s32.totalorder %s1059_s21, 3 }
  0x3b   : > { %p214_p10 = pnand %p851_p2, %p213_p7 }
  0x3c   : > { %s1204_s8 = sand.u32 (!%p214_p10), 1, %s1051_s19  }
  0x3d   : > { %217 = sbr.rel (%p214_p10) target bundleno = 612 (0x264), region = 40  ;;  %s852_s11 = sshll.u32 (!%p214_p10), %s1204_s8, 6 }
  0x3e   : > { %s220_s14 = scalar_lea.sflag (!%p214_p10), [#allocation3], %s1204_s8  ;;  %s223_s13 = scalar_lea.vmem (!%p214_p10), [#allocation2], %s852_s11 }
  0x44   : > { %1038 = dma.done.wait (%p1137_p6), %s220_s14, 1024  }
  0x45   : > { %1040 = vsyncadd (%p1137_p6), %s220_s14, 4294966272  ;;  %v1064_v0 = vmov 0.0   ;;  %v1065_v1 = vmov 0   ;;  %vm299_vm0 = vcmask 1041408   ;;  %vm1066_vm1 = vmmov 1   ;;  %v261_v3 = vld [vmem:[%s223_s13 + $0x8] sm:$0xff] }
  0x46   : > { %376 = vmatprep.mubr.f32.mxu0 %v1064_v0  ;;  %459 = vmatprep.mubr.f32.mxu1 %v1064_v0  ;;  %vm1212_vm2 = vmpackc.low %vm299_vm0, %vm1066_vm1  ;;  %v265_v4 = vld [vmem:[%s223_s13 + $0x28] sm:$0x3]  ;;  %v263_v5 = vld [vmem:[%s223_s13 + $0x18] sm:$0xff]  ;;  %vm289_vm3 = vcmask 80896   ;;  %vm501_vm4 = vcmask 1043456   ;;  %vm497_vm5 = vcmask 162816  }
  0x47   : > { %947 = vset.pattern.permute.xlu0 %v1065_v1  ;;  %948 = vset.pattern.permute.xlu1 %v1065_v1  ;;  %v883_v6 = vpack.c.bf16 %v265_v4, %v261_v3  ;;  %v267_v7 = vld [vmem:[%s223_s13 + $0x38] sm:$0x3]  ;;  %v260_v8 = vld [vmem:[%s223_s13] sm:$0xff]  ;;  %v262_v12 = vld [vmem:[%s223_s13 + $0x10] sm:$0xff]  ;;  %vm656_vm6 = vcmask 1044480   ;;  %s853_s9 = sshll.u32 %s1204_s8, 5 }
  0x48   : > { %v264_v9 = vld [vmem:[%s223_s13 + $0x20] sm:$0x3]  ;;  %v889_v10 = vpack.c.bf16 %v267_v7, %v263_v5  ;;  %v266_v13 = vld [vmem:[%s223_s13 + $0x30] sm:$0x3]  ;;  %v272_v18 = vld [vmem:[%s1321_s2 + $0x8] sm:$0xff]  ;;  %s249_s10 = scalar_lea.vmem [#allocation5], %s853_s9 }
  0x49   : > { %v886_v11 = vpack.c.bf16 %v264_v9, %v260_v8  ;;  %885 = vmatprep.subr.msk.bf16.mxu0 %vm1212_vm2, %v883_v6  ;;  %v892_v14 = vpack.c.bf16 %v266_v13, %v262_v12  ;;  %v271_v15 = vld [vmem:[%s1321_s2] sm:$0xff]  ;;  %v273_v17 = vld [vmem:[%s1321_s2 + $0x10] sm:$0xf]  ;;  %v269_v20 = vld [vmem:[%s1320_s1 + $0x8] sm:$0xff]  ;;  %s750_s12 = scalar_lea.sflag [#allocation4], %s1204_s8  ;;  %s871_s17 = sshll.u32 (%p1142_p9), %s1119_s22, 2 }
  0x4a   : > { %891 = vmatprep.subr.msk.bf16.mxu1 %vm1212_vm2, %v889_v10  ;;  %v268_v16 = vld [vmem:[%s1320_s1] sm:$0xff]  ;;  %276 = vperm.xlu0 %947, %v271_v15   ;;  %v270_v21 = vld [vmem:[%s1320_s1 + $0x10] sm:$0xf]  ;;  %s758_s23 = ssub.s32 (%p1142_p9), 6, %s871_s17 }
  0x4b   : > { %888 = vmatpush1.bf16.msk.msra.mxu0 %vm1212_vm2, %v886_v11  ;;  %894 = vmatpush1.bf16.msk.msra.mxu1 %vm1212_vm2, %v892_v14  ;;  %v491_v19 = vld [vmem:[%s1323_s4] sm:$0x1f]  ;;  %p759_p6 = scmp.lt.s32.totalorder (%p1142_p9), %s758_s23, 4 }
  0x4c   : > { %286 = vperm.xlu1 %948, %v273_v17  }
  0x4e   : > { %856 = vmatmul.mubr.msk.f32.vlgmr.msra.gmra.mrb[0].mxu0 %vm289_vm3, %v268_v16  ;;  %861 = vmatmul.mubr.msk.f32.vlgmr.msra.gmra.mrb[0].mxu1 %vm289_vm3, %v268_v16 }
  0x4f   : > { %382 = vmatprep.mubr.f32.mxu0 %v1064_v0  ;;  %465 = vmatprep.mubr.f32.mxu1 %v1064_v0 }
  0x50   : > { %281 = vperm.xlu0 %947, %v272_v18   ;;  %494 = vperm.xlu1 %948, %v491_v19  }
  0x52   : > { %857 = vmatmul.mubr.msk.f32.gmra.mrb[2].mxu0 %vm289_vm3, %v269_v20  ;;  %862 = vmatmul.mubr.msk.f32.gmra.mrb[2].mxu1 %vm289_vm3, %v269_v20 }
  0x53   : > { %388 = vmatprep.mubr.f32.mxu0 %v1064_v0  ;;  %471 = vmatprep.mubr.f32.mxu1 %v1064_v0 }
  0x56   : > { %858 = vmatmul.mubr.msk.f32.gmra.mrb[4].mxu0 %vm289_vm3, %v270_v21  ;;  %863 = vmatmul.mubr.msk.f32.gmra.mrb[4].mxu1 %vm289_vm3, %v270_v21 }
  0x57   : > { %578 = vmatprep.mubr.f32.mxu0 %v1064_v0  ;;  %649 = vmatprep.mubr.f32.mxu1 %v1064_v0  ;;  %v490_v0 = vld [vmem:[%s1322_s3] sm:$0x1f] }
  0xc9   : > { %v277_v22 = vpop.permute.xlu0 %276 }
  0xcb   : > { %v287_v46 = vpop.permute.xlu1 %286 }
  0xcf   : > { %v282_v29 = vpop.permute.xlu0 %281  ;;  %v495_v2 = vpop.permute.xlu1 %494 }
 0x121   : > { %v378_v23 = vpop.f32.mrb[0].mxu0  ;;  %v461_v24 = vpop.f32.mrb[0].mxu1 }
 0x122   : > { %v380_v25 = vpop.f32.mrb[1].mxu0  ;;  %v463_v26 = vpop.f32.mrb[1].mxu1  ;;  %v379_v27 = vadd.f32 %v378_v23, %v277_v22  ;;  %v462_v28 = vadd.f32 %v461_v24, %v277_v22 }
 0x123   : > { %v381_v30 = vadd.f32 %v380_v25, %v277_v22  ;;  %v464_v32 = vadd.f32 %v463_v26, %v277_v22 }
 0x124   : > { %v478_v39 = vmax.f32 %v379_v27, 0.0  ;;  %v480_v42 = vmax.f32 %v462_v28, 0.0 }
 0x125   : > { %v384_v31 = vpop.f32.mrb[2].mxu0  ;;  %v467_v34 = vpop.f32.mrb[2].mxu1  ;;  %v479_v43 = vmax.f32 %v381_v30, 0.0  ;;  %v481_v48 = vmax.f32 %v464_v32, 0.0 }
 0x126   : > { %v385_v33 = vadd.f32 %v384_v31, %v282_v29  ;;  %v386_v35 = vpop.f32.mrb[3].mxu0  ;;  %v468_v36 = vadd.f32 %v467_v34, %v282_v29  ;;  %v469_v38 = vpop.f32.mrb[3].mxu1 }
 0x127   : > { %v387_v37 = vadd.f32 %v386_v35, %v282_v29  ;;  %v470_v41 = vadd.f32 %v469_v38, %v282_v29 }
 0x128   : > { %v482_v40 = vmax.f32 %v385_v33, 0.0  ;;  %v484_v44 = vmax.f32 %v468_v36, 0.0 }
 0x129   : > { %v483_v45 = vmax.f32 %v387_v37, 0.0  ;;  %v390_v47 = vpop.f32.mrb[4].mxu0  ;;  %v485_v50 = vmax.f32 %v470_v41, 0.0  ;;  %v473_v51 = vpop.f32.mrb[4].mxu1 }
 0x12a   : > { %v897_v49 = vpack.c.bf16 %v482_v40, %v478_v39  ;;  %v392_v52 = vpop.f32.mrb[5].mxu0  ;;  %v901_v53 = vpack.c.bf16 %v484_v44, %v480_v42  ;;  %v475_v56 = vpop.f32.mrb[5].mxu1  ;;  %v391_v58 = vadd.f32 %v390_v47, %v287_v46  ;;  %v474_v60 = vadd.f32 %v473_v51, %v287_v46 }
 0x12b   : > { %v895_v54 = vpack.c.bf16 %v483_v45, %v479_v43  ;;  %v393_v55 = vadd.f32 %v392_v52, %v287_v46  ;;  %v899_v57 = vpack.c.bf16 %v485_v50, %v481_v48  ;;  %v476_v59 = vadd.f32 %v475_v56, %v287_v46 }
 0x12c   : > { %v486_v63 = vmax.f32 %v391_v58, 0.0  ;;  %v488_v1 = vmax.f32 %v474_v60, 0.0 }
 0x12d   : > { %v487_v61 = vmax.f32 %v393_v55, 0.0  ;;  %896 = vmatprep.subr.bf16.mxu0 %v895_v54  ;;  %v489_v62 = vmax.f32 %v476_v59, 0.0  ;;  %900 = vmatprep.subr.bf16.mxu1 %v899_v57 }
 0x12e   : > { %898 = vmatpush1.bf16.msra.mxu0 %v897_v49  ;;  %902 = vmatpush1.bf16.msra.mxu1 %v901_v53 }
 0x12f   : > { %864 = vmatprep.subr.msk.mxu0 %vm501_vm4, %v487_v61  ;;  %867 = vmatprep.subr.msk.mxu1 %vm501_vm4, %v489_v62 }
 0x132   : > { %865 = vmatpush1.msk.msra.mxu0 %vm501_vm4, %v486_v63  ;;  %868 = vmatpush1.msk.msra.mxu1 %vm501_vm4, %v488_v1 }
 0x133   : > { %866 = vmatmul.mubr.msk.f32.vlgmr.msra.gmra.mrb[6].mxu0 %vm497_vm5, %v490_v0  ;;  %869 = vmatmul.mubr.msk.f32.vlgmr.msra.gmra.mrb[6].mxu1 %vm497_vm5, %v490_v0 }
 0x206   : > { %v580_v3 = vpop.f32.mrb[6].mxu0  ;;  %v651_v5 = vpop.f32.mrb[6].mxu1 }
 0x207   : > { %v581_v4 = vadd.f32 %v580_v3, %v495_v2  ;;  %v582_v6 = vpop.f32.mrb[7].mxu0  ;;  %v652_v7 = vadd.f32 %v651_v5, %v495_v2  ;;  %v653_v9 = vpop.f32.mrb[7].mxu1 }
 0x208   : > { %v583_v8 = vadd.f32 %v582_v6, %v495_v2  ;;  %v654_v11 = vadd.f32 %v653_v9, %v495_v2 }
 0x209   : > { %v657_v10 = vsel %vm656_vm6, %v581_v4, -inf  ;;  %v671_v13 = vsel %vm656_vm6, %v652_v7, -inf }
 0x20a   : > { %v658_v12 = vrot.slane %v657_v10, 4  ;;  %v664_v14 = vsel %vm656_vm6, %v583_v8, -inf  ;;  %v672_v15 = vrot.slane %v671_v13, 4  ;;  %v678_v17 = vsel %vm656_vm6, %v654_v11, -inf }
 0x20b   : > { %v665_v16 = vrot.slane %v664_v14, 4  ;;  %v679_v19 = vrot.slane %v678_v17, 4 }
 0x20c   : > { %v659_v18 = vmax.f32 %v657_v10, %v658_v12  ;;  %v673_v20 = vmax.f32 %v671_v13, %v672_v15 }
 0x20d   : > { %v666_v21 = vmax.f32 %v664_v14, %v665_v16  ;;  %v680_v23 = vmax.f32 %v678_v17, %v679_v19 }
 0x20e   : > { %v660_v22 = vrot.slane %v659_v18, 2  ;;  %v674_v24 = vrot.slane %v673_v20, 2 }
 0x20f   : > { %v667_v25 = vrot.slane %v666_v21, 2  ;;  %v681_v27 = vrot.slane %v680_v23, 2 }
 0x210   : > { %v661_v26 = vmax.f32 %v659_v18, %v660_v22  ;;  %v675_v28 = vmax.f32 %v673_v20, %v674_v24 }
 0x211   : > { %v668_v29 = vmax.f32 %v666_v21, %v667_v25  ;;  %v682_v31 = vmax.f32 %v680_v23, %v681_v27 }
 0x212   : > { %v662_v30 = vrot.slane %v661_v26, 1  ;;  %v676_v32 = vrot.slane %v675_v28, 1 }
 0x213   : > { %v669_v33 = vrot.slane %v668_v29, 1  ;;  %v683_v35 = vrot.slane %v682_v31, 1 }
 0x214   : > { %v663_v34 = vmax.f32 %v661_v26, %v662_v30  ;;  %v677_v36 = vmax.f32 %v675_v28, %v676_v32 }
 0x215   : > { %v670_v37 = vmax.f32 %v668_v29, %v669_v33  ;;  %v684_v39 = vmax.f32 %v682_v31, %v683_v35 }
 0x216   : > { %v685_v38 = vsub.f32 %v581_v4, %v663_v34  ;;  %v687_v40 = vsub.f32 %v652_v7, %v677_v36 }
 0x217   : > { %v686_v41 = vsub.f32 %v583_v8, %v670_v37  ;;  %v688_v43 = vsub.f32 %v654_v11, %v684_v39 }
 0x218   : > { %v689_v42 = vmul.f32 1.442695, %v685_v38  ;;  %v693_v44 = vmul.f32 1.442695, %v687_v40 }
 0x219   : > { %v691_v45 = vmul.f32 1.442695, %v686_v41  ;;  %v695_v46 = vmul.f32 1.442695, %v688_v43 }
 0x21a   : > { %949 = vpow2.f32 %v689_v42 }
 0x21b   : > { %951 = vpow2.f32 %v693_v44 }
 0x21c   : > { %953 = vpow2.f32 %v691_v45 }
 0x21d   : > { %955 = vpow2.f32 %v695_v46 }
 0x224   : > { %v950_v47 = vpop.eup %949 }
 0x225   : > { %v952_v48 = vpop.eup %951  ;;  %v697_v49 = vsel %vm656_vm6, %v950_v47, 0.0 }
 0x226   : > { %v954_v50 = vpop.eup %953  ;;  %v698_v51 = vrot.slane %v697_v49, 4  ;;  %v711_v52 = vsel %vm656_vm6, %v952_v48, 0.0 }
 0x227   : > { %v956_v53 = vpop.eup %955  ;;  %v712_v54 = vrot.slane %v711_v52, 4  ;;  %v704_v55 = vsel %vm656_vm6, %v954_v50, 0.0 }
 0x228   : > { %v699_v56 = vadd.f32 %v698_v51, %v697_v49  ;;  %v705_v57 = vrot.slane %v704_v55, 4  ;;  %v718_v58 = vsel %vm656_vm6, %v956_v53, 0.0 }
 0x229   : > { %v713_v59 = vadd.f32 %v712_v54, %v711_v52  ;;  %v719_v60 = vrot.slane %v718_v58, 4 }
 0x22a   : > { %v700_v61 = vrot.slane %v699_v56, 2  ;;  %v706_v62 = vadd.f32 %v705_v57, %v704_v55 }
 0x22b   : > { %v714_v63 = vrot.slane %v713_v59, 2  ;;  %v720_v0 = vadd.f32 %v719_v60, %v718_v58 }
 0x22c   : > { %v701_v1 = vadd.f32 %v700_v61, %v699_v56  ;;  %v707_v2 = vrot.slane %v706_v62, 2 }
 0x22d   : > { %v715_v3 = vadd.f32 %v714_v63, %v713_v59  ;;  %v721_v4 = vrot.slane %v720_v0, 2 }
 0x22e   : > { %v702_v5 = vrot.slane %v701_v1, 1  ;;  %v708_v6 = vadd.f32 %v707_v2, %v706_v62 }
 0x22f   : > { %v716_v7 = vrot.slane %v715_v3, 1  ;;  %v722_v8 = vadd.f32 %v721_v4, %v720_v0 }
 0x230   : > { %v703_v9 = vadd.f32 %v702_v5, %v701_v1  ;;  %v709_v10 = vrot.slane %v708_v6, 1 }
 0x231   : > { %v717_v11 = vadd.f32 %v716_v7, %v715_v3  ;;  %v723_v12 = vrot.slane %v722_v8, 1 }
 0x232   : > { %957 = vrcp.f32 %v703_v9  ;;  %v710_v13 = vadd.f32 %v709_v10, %v708_v6 }
 0x233   : > { %959 = vrcp.f32 %v717_v11  ;;  %v724_v14 = vadd.f32 %v723_v12, %v722_v8 }
 0x234   : > { %961 = vrcp.f32 %v710_v13 }
 0x235   : > { %963 = vrcp.f32 %v724_v14 }
 0x23c   : > { %v958_v15 = vpop.eup %957 }
 0x23d   : > { %v960_v16 = vpop.eup %959  ;;  %v729_v17 = vmul.f32 %v958_v15, %v703_v9 }
 0x23e   : > { %v962_v18 = vpop.eup %961  ;;  %v731_v19 = vmul.f32 %v960_v16, %v717_v11 }
 0x23f   : > { %v964_v20 = vpop.eup %963  ;;  %v733_v21 = vsub.f32 2.0, %v729_v17  ;;  %v730_v22 = vmul.f32 %v962_v18, %v710_v13 }
 0x240   : > { %v735_v23 = vsub.f32 2.0, %v731_v19  ;;  %v732_v24 = vmul.f32 %v964_v20, %v724_v14 }
 0x241   : > { %v737_v25 = vmul.f32 %v958_v15, %v733_v21  ;;  %v734_v26 = vsub.f32 2.0, %v730_v22 }
 0x242   : > { %v739_v27 = vmul.f32 %v960_v16, %v735_v23  ;;  %v736_v28 = vsub.f32 2.0, %v732_v24  ;;  %756 = sbr.rel (!%p1142_p9) target bundleno = 612 (0x264), region = 48 }
 0x243   : > { %v741_v29 = vmul.f32 %v950_v47, %v737_v25  ;;  %v738_v30 = vmul.f32 %v962_v18, %v734_v26 }
 0x244   : > { %v743_v31 = vmul.f32 %v952_v48, %v739_v27  ;;  %v740_v32 = vmul.f32 %v964_v20, %v736_v28 }
 0x245   : > { %745 = vst [vmem:[%s249_s10] sm:$0x1f] %v741_v29  ;;  %v742_v33 = vmul.f32 %v954_v50, %v738_v30 }
 0x246   : > { %747 = vst [vmem:[%s249_s10 + $0x10] sm:$0x1f] %v743_v31  ;;  %v744_v34 = vmul.f32 %v956_v53, %v740_v32 }
 0x247   : > { %746 = vst [vmem:[%s249_s10 + $0x8] sm:$0x1f] %v742_v33 }
 0x248   : > { %748 = vst [vmem:[%s249_s10 + $0x18] sm:$0x1f] %v744_v34 }
 0x249   : > { %s1340_s23 = smov (!%p759_p6, %s758_s23), 4 }
 0x24a   : > { %s1267_s25 = sshll.u32 %s1340_s23, 7 }
 0x24b   : > { %s763_s15 = ssub.s32 512, %s1267_s25 }
 0x24c   : > { %764 = vsyncadd %s750_s12, %s763_s15  ;;  %p873_p11 = scmp.ne.s32.totalorder %s1267_s25, 0  ;;  %s882_s16 = sshll.u32 %s1119_s22, 9 }
 0x24d   : > { %s1277_s26 = scalar_lea.hbm %s1324_s5, %s882_s16  ;;  %s770_s7 = sshll.u32 %s249_s10, 4  ;;  %s771_s7 = int_to_ptr.vmem [resolvable:$true] %s770_s7 }
 0x24e   : > { %s993_s11 = scalar_lea.vmem %s771_s7, %s1267_s25  ;;  %s1067_s14 = smov [#allocation5]  }
 0x24f   : > { %p994_p9 = scmp.ne.s32.totalorder %s771_s7, %s993_s11  ;;  %s997_s13 = sshll.u32 %s1067_s14, 4  ;;  %s998_s13 = int_to_ptr.vmem [resolvable:$false] %s997_s13 }
 0x250   : > { %s999_s28 = scalar_lea.vmem %s998_s13, 1024  ;;  %p1000_p12 = scmp.lt.s32.totalorder %s771_s7, %s998_s13 }
 0x251   : > { %p995_p13 = pnand %p994_p9, %p873_p11  ;;  %p1001_p0 = scmp.lt.s32.totalorder %s999_s28, %s993_s11 }
 0x253   : > { %p996_p8 = pneg %p995_p13  ;;  %p1002_p1 = por %p1001_p0, %p1000_p12 }
 0x255   : > { %p1003_p3 = pnand %p1002_p1, %p996_p8 }
 0x257   : > { %1006 = shalt.err (!%p1003_p3)
}
 0x258   : > { %s1007_s22 = scalar_lea.hbm %s1277_s26, %s1267_s25  ;;  %s1011_s17 = scalar_lea.hbm %s1324_s5, 768 }
 0x259   : > { %p1008_p4 = scmp.ne.s32.totalorder %s1277_s26, %s1007_s22  ;;  %p1012_p7 = scmp.lt.u32.totalorder %s1277_s26, %s1324_s5 }
 0x25a   : > { %p1013_p10 = scmp.lt.u32.totalorder %s1011_s17, %s1007_s22  ;;  %p1015_p9 = scmp.lt.u32.totalorder %s1007_s22, %s1277_s26 }
 0x25b   : > { %p1009_p5 = pnand %p1008_p4, %p873_p11 }
 0x25c   : > { %p1014_p6 = por %p1013_p10, %p1012_p7 }
 0x25d   : > { %p1010_p2 = pneg %p1009_p5 }
 0x25e   : > { %p1016_p13 = por %p1015_p9, %p1014_p6 }
 0x260   : > { %p1017_p8 = pnand %p1016_p13, %p1010_p2 }
 0x262   : > { %1020 = shalt.err (!%p1017_p8)
}
 0x263   : > { %773 = dma.vmem_to_hbm [thread:$0]  (%p873_p11), %s771_s7, %s1267_s25, %s1277_s26, %s750_s12  }
 0x264 PF: > { %s782_s16 = sand.u32 1, %s1047_s18   ;;  %p1331_p12 = scmp.ne.s32.totalorder %s1328_s30, 0 }
 0x265   : > { %p1332_p0 = scmp.ge.s32.totalorder %s1059_s21, 2  ;;  %s783_s29 = scalar_lea.sflag [#allocation4], %s782_s16 }
 0x267   : > { %p906_p1 = pnand %p1332_p0, %p1331_p12 }
 0x269   : > { %1042 = dma.done.wait (!%p906_p1), %s783_s29, 512  }
 0x26a   : > { %1044 = vsyncadd (!%p906_p1), %s783_s29, 4294966784  ;;  %p18_p3 = scmp.ge.s32.totalorder %s1123_s24, 4   ;;  %s1333_s18 = smov %s1051_s19 }
 0x26b   : > { %s1334_s19 = smov %s1055_s20  ;;  %s1335_s20 = smov %s1135_s27 }
 0x26c   : > { %s1336_s21 = smov %s1123_s24  ;;  %20 = sbr.rel (!%p18_p3) target bundleno = 5 (0x5), region = 85 }
 0x273   :  { %788 = vsyncpa [#allocation3], 1 }
 0x274   :  { %790 = vsyncpa [#allocation3 + $0x1], 1 }
 0x275   :  { %791 = vsyncpa [#allocation4], 1 }
 0x276   :  { %793 = vsyncpa [#allocation4 + $0x1], 1 }

</bundles_post_ra>
